<compile_context>
chip_gen: v7x
topology: tpu7x:2x2x1
jax: 0.10.0
libtpu: 0.0.40
codegen_flags: <defaults>
</compile_context>

<pallas_src>
import functools

import jax
import jax.numpy as jnp
from jax import lax
from jax.experimental import pallas as pl
from jax.experimental.pallas import tpu as pltpu

_NEG_INF = -1e30
_LANE = 128


def _round_up(x, m):
    return ((x + m - 1) // m) * m


def _vmem_capacity_bytes():
    """Best-effort per-core VMEM capacity; conservative 64 MiB fallback."""
    try:
        info = pltpu.get_tpu_info()
        for name in ("vmem_capacity_bytes", "vmem_size_bytes", "vmem_bytes"):
            v = getattr(info, name, None)
            if v:
                return int(v)
    except Exception:
        pass
    return 64 * 1024 * 1024


def _const_block_spec(block_shape, index_map):
    """Grid-invariant (weight/bias) block: single-buffered when supported."""
    if hasattr(pl, "Buffered"):
        try:
            return pl.BlockSpec(block_shape, index_map,
                                pipeline_mode=pl.Buffered(buffer_count=1))
        except TypeError:  # older BlockSpec without pipeline_mode
            pass
    return pl.BlockSpec(block_shape, index_map)


# ---------------------------------------------------------------------------
# K/V pre-projection kernel: y = x @ W + b, rows beyond seq_len zeroed.
# ---------------------------------------------------------------------------
def _project_kernel(x_ref, w_ref, b_ref, o_ref, *, seq_len, tk, mask_rows):
    x = x_ref[...]
    if x.dtype != w_ref.dtype:
        x = x.astype(w_ref.dtype)
    y = jnp.dot(x, w_ref[...], preferred_element_type=jnp.float32) + b_ref[...]
    if mask_rows:
        # Runs once per row total (projection grid), so the mask cost is
        # amortized out of the attention kernel's steady state.
        rows = pl.program_id(1) * tk + lax.broadcasted_iota(jnp.int32, (tk, 1), 0)
        y = jnp.where(rows < seq_len, y, 0.0)
    o_ref[...] = y.astype(o_ref.dtype)


def _projection(x, w, b, *, s_pad, tk, out_dtype, seq_len, vmem_limit):
    B, S, F = x.shape
    Dp = w.shape[1]
    nk = s_pad // tk
    kernel = functools.partial(_project_kernel, seq_len=seq_len, tk=tk,
                               mask_rows=(S % tk) != 0)
    return pl.pallas_call(
        kernel,
        out_shape=jax.ShapeDtypeStruct((B, s_pad, Dp), out_dtype),
        grid_spec=pltpu.PrefetchScalarGridSpec(
            num_scalar_prefetch=0,
            grid=(B, nk),
            in_specs=[
                pl.BlockSpec((None, tk, F), lambda b, i: (b, i, 0)),
                _const_block_spec((F, Dp), lambda b, i: (0, 0)),
                _const_block_spec((1, Dp), lambda b, i: (0, 0)),
            ],
            out_specs=pl.BlockSpec((None, tk, Dp), lambda b, i: (b, i, 0)),
        ),
        compiler_params=pltpu.CompilerParams(
            dimension_semantics=("parallel", "parallel"),
            vmem_limit_bytes=vmem_limit,
        ),
    )(x, w, b)


# ---------------------------------------------------------------------------
# Flash attention kernel (fused-QKV-projection or pre-projected-K/V variant).
# ---------------------------------------------------------------------------
def _attention_kernel(*refs, fused, inv_scale, seq_len, tk, mask_kv,
                      compute_dtype):
    if fused:
        (q_ref, k_ref, v_ref, wq_ref, wk_ref, wv_ref,
         bq_ref, bk_ref, bv_ref, o_ref,
         q_scr, acc_scr, m_scr, l_scr) = refs
    else:
        (q_ref, kp_ref, vp_ref, wq_ref, bq_ref, o_ref,
         q_scr, acc_scr, m_scr, l_scr) = refs

    ki = pl.program_id(2)
    nk = pl.num_programs(2)

    @pl.when(ki == 0)
    def _init():
        # Project + pre-scale Q once per (batch, q-tile); keep it resident.
        x = q_ref[...]
        if x.dtype != wq_ref.dtype:
            x = x.astype(wq_ref.dtype)
        q = jnp.dot(x, wq_ref[...], preferred_element_type=jnp.float32)
        q = (q + bq_ref[...]) * inv_scale          # fold 1/sqrt(Dqkv) into Q
        q_scr[...] = q.astype(q_scr.dtype)
        m_scr[...] = jnp.full_like(m_scr, _NEG_INF)
        l_scr[...] = jnp.zeros_like(l_scr)
        acc_scr[...] = jnp.zeros_like(acc_scr)

    if fused:
        # Single-query-tile path: project the K/V tile in-kernel (each row is
        # projected exactly once, so there is no redundant MXU/HBM work).
        xk = k_ref[...]
        xv = v_ref[...]
        if xk.dtype != wk_ref.dtype:
            xk = xk.astype(wk_ref.dtype)
        if xv.dtype != wv_ref.dtype:
            xv = xv.astype(wv_ref.dtype)
        k = jnp.dot(xk, wk_ref[...], preferred_element_type=jnp.float32) + bk_ref[...]
        v = jnp.dot(xv, wv_ref[...], preferred_element_type=jnp.float32) + bv_ref[...]
        if mask_kv:
            rows = ki * tk + lax.broadcasted_iota(jnp.int32, (tk, 1), 0)
            keep = rows < seq_len
            k = jnp.where(keep, k, 0.0)
            v = jnp.where(keep, v, 0.0)
        k = k.astype(compute_dtype)
        v = v.astype(compute_dtype)
    else:
        # Pre-projected tiles: already compute_dtype, padded rows already zero.
        k = kp_ref[...]
        v = vp_ref[...]

    # Scores: contract on the last dims (no K.T materialization / XLU pass).
    s = lax.dot_general(q_scr[...], k, (((1,), (1,)), ((), ())),
                        preferred_element_type=jnp.float32)

    if mask_kv:
        # Cheap additive column bias (1, tk) instead of a full (tq, tk)
        # iota+compare+select per step; zeroed K rows make s finite here.
        cols = ki * tk + lax.broadcasted_iota(jnp.int32, (1, tk), 1)
        s = s + jnp.where(cols < seq_len, 0.0, _NEG_INF)

    # Online softmax update.
    m_prev = m_scr[...]
    m_new = jnp.maximum(m_prev, jnp.max(s, axis=-1, keepdims=True))
    alpha = jnp.exp(m_prev - m_new)
    # TODO(synk): on v6e/v7x exp could run in bf16 on the EUP; kept f32 so the
    # same kernel stays optimal on v5e (no bf16 VPU/EUP).
    p = jnp.exp(s - m_new)

    l_scr[...] = alpha * l_scr[...] + jnp.sum(p, axis=-1, keepdims=True)
    acc_scr[...] = alpha * acc_scr[...] + jnp.dot(
        p.astype(compute_dtype), v, preferred_element_type=jnp.float32)
    m_scr[...] = m_new

    @pl.when(ki == nk - 1)
    def _finalize():
        inv_l = pl.reciprocal(l_scr[...], approx=True)       # EUP slot
        inv_l = inv_l * (2.0 - l_scr[...] * inv_l)            # one Newton step
        o_ref[...] = (acc_scr[...] * inv_l).astype(o_ref.dtype)


# ---------------------------------------------------------------------------
# Wrapper
# ---------------------------------------------------------------------------
def attention_head(query, key, value, wq, wk, wv, bq, bk, bv, *,
                   q_tile=None, kv_tile=None, use_bf16_compute=False,
                   return_padded=False, vmem_limit_bytes=None):
    """query/key/value: (B, S, F); w*: (F, Dqkv); b*: (Dqkv,).

    Returns (B, S, Dqkv), or (B, S, Dp) with Dp = round_up(Dqkv, 128) when
    return_padded=True (skips the extra HBM slice pass).
    """
    B, S, F = query.shape
    Dqkv = wq.shape[1]
    out_dtype = query.dtype

    Dp = _round_up(Dqkv, _LANE)
    pad = Dp - Dqkv

    # MXU-operand dtype: bf16 for bf16 inputs, or opt-in bf16 fast path for
    # f32 inputs; otherwise f32 (exact-reference path).
    compute_dtype = (jnp.bfloat16
                     if (query.dtype == jnp.bfloat16 or use_bf16_compute)
                     else jnp.float32)

    # Pad head dim to a lane-dense multiple of 128 (zero weights/biases keeps
    # the math identical); cast weights to the MXU operand dtype, biases f32.
    def prep_w(w):
        w = w.astype(compute_dtype)
        return jnp.pad(w, ((0, 0), (0, pad))) if pad else w

    def prep_b(b):
        b = b.astype(jnp.float32)
        if pad:
            b = jnp.pad(b, (0, pad))
        return b.reshape(1, Dp)

    wq_p, wk_p, wv_p = prep_w(wq), prep_w(wk), prep_w(wv)
    bq_p, bk_p, bv_p = prep_b(bq), prep_b(bk), prep_b(bv)

    # ---- Tile / VMEM budget, derived from the detected generation ----------
    in_bytes = jnp.dtype(query.dtype).itemsize
    c_bytes = jnp.dtype(compute_dtype).itemsize
    out_bytes = jnp.dtype(out_dtype).itemsize
    w_bytes = c_bytes

    vmem_cap = _vmem_capacity_bytes()
    budget = int(vmem_cap * 0.45)

    def working_set(t):
        t = min(t, _round_up(S, 8))
        ws_pre = (2 * t * F * in_bytes            # Q raw, double-buffered
                  + 4 * t * Dp * c_bytes          # Kp, Vp double-buffered
                  + F * Dp * w_bytes + 4 * Dp     # wq + bq single-buffered
                  + 2 * t * Dp * out_bytes        # out, double-buffered
                  + t * Dp * (c_bytes + 4)        # q_scr + acc scratch
                  + 8 * t)                        # m/l scratch
        ws_fused = (6 * t * F * in_bytes
                    + 3 * F * Dp * w_bytes + 12 * Dp
                    + 2 * t * Dp * out_bytes
                    + t * Dp * (c_bytes + 4) + 8 * t)
        return max(ws_pre, ws_fused)

    if q_tile is None or kv_tile is None:
        chosen = 128
        for cand in (512, 256, 128):              # biggest tile that fits
            if working_set(cand) <= budget:
                chosen = cand
                break
        q_tile = q_tile or chosen
        kv_tile = kv_tile or chosen

    tq = S if S <= q_tile else q_tile
    tk = S if S <= kv_tile else kv_tile
    nq = pl.cdiv(S, tq)
    nk = pl.cdiv(S, tk)
    mask_kv = (S % tk) != 0
    fused = (nq == 1)    # only fuse K/V projection when each row is hit once

    if vmem_limit_bytes is None:
        ws = working_set(max(tq, tk))
        vmem_limit_bytes = int(min(max(ws * 3 // 2 + (4 << 20), 32 << 20),
                                   max(vmem_cap - (4 << 20), 32 << 20)))

    inv_scale = 1.0 / (Dqkv ** 0.5)

    kernel = functools.partial(
        _attention_kernel, fused=fused, inv_scale=inv_scale, seq_len=S,
        tk=tk, mask_kv=mask_kv, compute_dtype=compute_dtype)

    seq_q_spec = pl.BlockSpec((None, tq, F), lambda b, qi, ki: (b, qi, 0))
    out_spec = pl.BlockSpec((None, tq, Dp), lambda b, qi, ki: (b, qi, 0))
    w_spec = _const_block_spec((F, Dp), lambda b, qi, ki: (0, 0))
    b_spec = _const_block_spec((1, Dp), lambda b, qi, ki: (0, 0))

    if fused:
        seq_kv_spec = pl.BlockSpec((None, tk, F), lambda b, qi, ki: (b, ki, 0))
        in_specs = [seq_q_spec, seq_kv_spec, seq_kv_spec,
                    w_spec, w_spec, w_spec,
                    b_spec, b_spec, b_spec]
        operands = (query, key, value, wq_p, wk_p, wv_p, bq_p, bk_p, bv_p)
    else:
        # Pre-project K/V once per row into lane-dense compute-dtype slabs.
        s_pad = nk * tk
        kp = _projection(key, wk_p, bk_p, s_pad=s_pad, tk=tk,
                         out_dtype=compute_dtype, seq_len=S,
                         vmem_limit=vmem_limit_bytes)
        vp = _projection(value, wv_p, bv_p, s_pad=s_pad, tk=tk,
                         out_dtype=compute_dtype, seq_len=S,
                         vmem_limit=vmem_limit_bytes)
        kv_spec = pl.BlockSpec((None, tk, Dp), lambda b, qi, ki: (b, ki, 0))
        in_specs = [seq_q_spec, kv_spec, kv_spec, w_spec, b_spec]
        operands = (query, kp, vp, wq_p, bq_p)

    out_padded = pl.pallas_call(
        kernel,
        out_shape=jax.ShapeDtypeStruct((B, S, Dp), out_dtype),
        grid_spec=pltpu.PrefetchScalarGridSpec(
            num_scalar_prefetch=0,
            grid=(B, nq, nk),
            in_specs=in_specs,
            out_specs=out_spec,
            scratch_shapes=[
                pltpu.VMEM((tq, Dp), compute_dtype),   # projected, scaled Q
                pltpu.VMEM((tq, Dp), jnp.float32),     # output accumulator
                pltpu.VMEM((tq, 1), jnp.float32),      # running max
                pltpu.VMEM((tq, 1), jnp.float32),      # running denom
            ],
        ),
        compiler_params=pltpu.CompilerParams(
            dimension_semantics=("parallel", "parallel", "arbitrary"),
            vmem_limit_bytes=vmem_limit_bytes,
        ),
    )(*operands)

    if pad and not return_padded:
        # TODO(synk): consumers that can read the lane-padded layout should
        # pass return_padded=True to skip this extra output HBM pass.
        return out_padded[..., :Dqkv]
    return out_padded


def attention_head_ref(query, key, value, wq, wk, wv, bq, bk, bv):
    """Pure-JAX reference mirroring the PyTorch forward."""
    Q = query @ wq + bq
    K = key @ wk + bk
    V = value @ wv + bv
    scale = Q.shape[-1] ** 0.5
    scores = jnp.einsum("bqd,bkd->bqk", Q, K) / scale
    attn = jax.nn.softmax(scores, axis=-1)
    return jnp.einsum("bqk,bkd->bqd", attn, V)


def _run_case(B, S, F, Dqkv, **kwargs):
    keys = jax.random.split(jax.random.PRNGKey(0), 9)
    q = jax.random.normal(keys[0], (B, S, F), jnp.float32)
    k = jax.random.normal(keys[1], (B, S, F), jnp.float32)
    v = jax.random.normal(keys[2], (B, S, F), jnp.float32)

    wscale = 1.0 / (F ** 0.5)
    wq = jax.random.uniform(keys[3], (F, Dqkv), jnp.float32, -wscale, wscale)
    wk = jax.random.uniform(keys[4], (F, Dqkv), jnp.float32, -wscale, wscale)
    wv = jax.random.uniform(keys[5], (F, Dqkv), jnp.float32, -wscale, wscale)
    bq = jax.random.uniform(keys[6], (Dqkv,), jnp.float32, -wscale, wscale)
    bk = jax.random.uniform(keys[7], (Dqkv,), jnp.float32, -wscale, wscale)
    bv = jax.random.uniform(keys[8], (Dqkv,), jnp.float32, -wscale, wscale)

    out = attention_head(q, k, v, wq, wk, wv, bq, bk, bv, **kwargs)
    out = jax.block_until_ready(out)
    ref = attention_head_ref(q, k, v, wq, wk, wv, bq, bk, bv)
    assert out.shape == ref.shape, (out.shape, ref.shape)
    assert jnp.allclose(out, ref, atol=1e-3, rtol=1e-3), \
        f"mismatch vs JAX reference (B={B}, S={S})"


if __name__ == "__main__":
    # Small shapes implied by the module: batch=2, seq=8, features=32, dim_qkv=16.
    _run_case(2, 8, 32, 16)                         # fused single-tile path
    _run_case(2, 20, 32, 16, q_tile=8, kv_tile=8)   # pre-projected K/V + ragged tiles
    print("KERNEL_OK")
</pallas_src>

<mosaic_0001>
module attributes {stable_mosaic.version = 11 : i64} {
  func.func @_attention_kernel(%arg0: i32, %arg1: i32, %arg2: i32, %arg3: memref<1x8x32xf32, #tpu.memory_space<vmem>>, %arg4: memref<1x8x32xf32, #tpu.memory_space<vmem>>, %arg5: memref<1x8x32xf32, #tpu.memory_space<vmem>>, %arg6: memref<32x128xf32, #tpu.memory_space<vmem>>, %arg7: memref<32x128xf32, #tpu.memory_space<vmem>>, %arg8: memref<32x128xf32, #tpu.memory_space<vmem>>, %arg9: memref<1x128xf32, #tpu.memory_space<vmem>>, %arg10: memref<1x128xf32, #tpu.memory_space<vmem>>, %arg11: memref<1x128xf32, #tpu.memory_space<vmem>>, %arg12: memref<1x8x128xf32, #tpu.memory_space<vmem>>, %arg13: memref<8x128xf32, #tpu.memory_space<vmem>>, %arg14: memref<8x128xf32, #tpu.memory_space<vmem>>, %arg15: memref<8x1xf32, #tpu.memory_space<vmem>>, %arg16: memref<8x1xf32, #tpu.memory_space<vmem>>) attributes {dimension_semantics = [#tpu.dimension_semantics<parallel>, #tpu.dimension_semantics<parallel>, #tpu.dimension_semantics<arbitrary>], iteration_bounds = array<i64: 2, 1, 1>, scalar_prefetch = 0 : i64, scratch_operands = 4 : i64, tpu.core_type = #tpu.core_type<tc>, window_params = [{transform_indices = @transform_0, window_bounds = array<i64: 1, 8, 32>}, {transform_indices = @transform_1, window_bounds = array<i64: 1, 8, 32>}, {transform_indices = @transform_2, window_bounds = array<i64: 1, 8, 32>}, {pipeline_mode = #tpu.pipeline_mode<synchronous>, transform_indices = @transform_3, window_bounds = array<i64: 32, 128>}, {pipeline_mode = #tpu.pipeline_mode<synchronous>, transform_indices = @transform_4, window_bounds = array<i64: 32, 128>}, {pipeline_mode = #tpu.pipeline_mode<synchronous>, transform_indices = @transform_5, window_bounds = array<i64: 32, 128>}, {pipeline_mode = #tpu.pipeline_mode<synchronous>, transform_indices = @transform_6, window_bounds = array<i64: 1, 128>}, {pipeline_mode = #tpu.pipeline_mode<synchronous>, transform_indices = @transform_7, window_bounds = array<i64: 1, 128>}, {pipeline_mode = #tpu.pipeline_mode<synchronous>, transform_indices = @transform_8, window_bounds = array<i64: 1, 128>}, {transform_indices = @transform_9, window_bounds = array<i64: 1, 8, 128>}]} {
    %c0_i32 = arith.constant 0 : i32
    %0 = arith.cmpi eq, %arg2, %c0_i32 : i32
    %1 = arith.extui %0 : i1 to i32
    %c0_i32_0 = arith.constant 0 : i32
    %2 = arith.cmpi ne, %1, %c0_i32_0 : i32
    scf.if %2 {
      %c0_35 = arith.constant 0 : index
      %c0_36 = arith.constant 0 : index
      %c0_37 = arith.constant 0 : index
      %44 = vector.load %arg3[%c0_35, %c0_36, %c0_37] : memref<1x8x32xf32, #tpu.memory_space<vmem>>, vector<1x8x32xf32>
      %45 = vector.shape_cast %44 : vector<1x8x32xf32> to vector<8x32xf32>
      %c0_38 = arith.constant 0 : index
      %c0_39 = arith.constant 0 : index
      %46 = vector.load %arg6[%c0_38, %c0_39] : memref<32x128xf32, #tpu.memory_space<vmem>>, vector<32x128xf32>
      %cst_40 = arith.constant dense<0.000000e+00> : vector<8x128xf32>
      %47 = tpu.matmul %45, %46, %cst_40 {dimension_numbers = #tpu.dot_dimension_numbers<[1], [0], [0], [1], [0, 0, 1, 1], [], []>} : vector<8x32xf32>, vector<32x128xf32>, vector<8x128xf32> -> vector<8x128xf32>
      %c0_41 = arith.constant 0 : index
      %c0_42 = arith.constant 0 : index
      %48 = vector.load %arg9[%c0_41, %c0_42] : memref<1x128xf32, #tpu.memory_space<vmem>>, vector<1x128xf32>
      %49 = vector.broadcast %48 : vector<1x128xf32> to vector<8x128xf32>
      %50 = arith.addf %47, %49 : vector<8x128xf32>
      %cst_43 = arith.constant 2.500000e-01 : f32
      %51 = vector.broadcast %cst_43 : f32 to vector<8x128xf32>
      %52 = arith.mulf %50, %51 : vector<8x128xf32>
      %c0_44 = arith.constant 0 : index
      %c0_45 = arith.constant 0 : index
      %53 = vector.load %arg13[%c0_44, %c0_45] : memref<8x128xf32, #tpu.memory_space<vmem>>, vector<8x128xf32>
      tpu.vector_store %arg13[%c0_44, %c0_45], %52 {strides = array<i32>} : memref<8x128xf32, #tpu.memory_space<vmem>>, vector<8x128xf32>,
      %cst_46 = arith.constant -1.000000e+30 : f32
      %54 = vector.broadcast %cst_46 : f32 to vector<8x1xf32>
      %c0_47 = arith.constant 0 : index
      %c0_48 = arith.constant 0 : index
      %55 = vector.load %arg15[%c0_47, %c0_48] : memref<8x1xf32, #tpu.memory_space<vmem>>, vector<8x1xf32>
      tpu.vector_store %arg15[%c0_47, %c0_48], %54 {strides = array<i32>} : memref<8x1xf32, #tpu.memory_space<vmem>>, vector<8x1xf32>,
      %cst_49 = arith.constant 0.000000e+00 : f32
      %56 = vector.broadcast %cst_49 : f32 to vector<8x1xf32>
      %c0_50 = arith.constant 0 : index
      %c0_51 = arith.constant 0 : index
      %57 = vector.load %arg16[%c0_50, %c0_51] : memref<8x1xf32, #tpu.memory_space<vmem>>, vector<8x1xf32>
      tpu.vector_store %arg16[%c0_50, %c0_51], %56 {strides = array<i32>} : memref<8x1xf32, #tpu.memory_space<vmem>>, vector<8x1xf32>,
      %cst_52 = arith.constant 0.000000e+00 : f32
      %58 = vector.broadcast %cst_52 : f32 to vector<8x128xf32>
      %c0_53 = arith.constant 0 : index
      %c0_54 = arith.constant 0 : index
      %59 = vector.load %arg14[%c0_53, %c0_54] : memref<8x128xf32, #tpu.memory_space<vmem>>, vector<8x128xf32>
      tpu.vector_store %arg14[%c0_53, %c0_54], %58 {strides = array<i32>} : memref<8x128xf32, #tpu.memory_space<vmem>>, vector<8x128xf32>,
    } else {
    }
    %c0 = arith.constant 0 : index
    %c0_1 = arith.constant 0 : index
    %c0_2 = arith.constant 0 : index
    %3 = vector.load %arg4[%c0, %c0_1, %c0_2] : memref<1x8x32xf32, #tpu.memory_space<vmem>>, vector<1x8x32xf32>
    %4 = vector.shape_cast %3 : vector<1x8x32xf32> to vector<8x32xf32>
    %c0_3 = arith.constant 0 : index
    %c0_4 = arith.constant 0 : index
    %c0_5 = arith.constant 0 : index
    %5 = vector.load %arg5[%c0_3, %c0_4, %c0_5] : memref<1x8x32xf32, #tpu.memory_space<vmem>>, vector<1x8x32xf32>
    %6 = vector.shape_cast %5 : vector<1x8x32xf32> to vector<8x32xf32>
    %c0_6 = arith.constant 0 : index
    %c0_7 = arith.constant 0 : index
    %7 = vector.load %arg7[%c0_6, %c0_7] : memref<32x128xf32, #tpu.memory_space<vmem>>, vector<32x128xf32>
    %cst = arith.constant dense<0.000000e+00> : vector<8x128xf32>
    %8 = tpu.matmul %4, %7, %cst {dimension_numbers = #tpu.dot_dimension_numbers<[1], [0], [0], [1], [0, 0, 1, 1], [], []>} : vector<8x32xf32>, vector<32x128xf32>, vector<8x128xf32> -> vector<8x128xf32>
    %c0_8 = arith.constant 0 : index
    %c0_9 = arith.constant 0 : index
    %9 = vector.load %arg10[%c0_8, %c0_9] : memref<1x128xf32, #tpu.memory_space<vmem>>, vector<1x128xf32>
    %10 = vector.broadcast %9 : vector<1x128xf32> to vector<8x128xf32>
    %11 = arith.addf %8, %10 : vector<8x128xf32>
    %c0_10 = arith.constant 0 : index
    %c0_11 = arith.constant 0 : index
    %12 = vector.load %arg8[%c0_10, %c0_11] : memref<32x128xf32, #tpu.memory_space<vmem>>, vector<32x128xf32>
    %cst_12 = arith.constant dense<0.000000e+00> : vector<8x128xf32>
    %13 = tpu.matmul %6, %12, %cst_12 {dimension_numbers = #tpu.dot_dimension_numbers<[1], [0], [0], [1], [0, 0, 1, 1], [], []>} : vector<8x32xf32>, vector<32x128xf32>, vector<8x128xf32> -> vector<8x128xf32>
    %c0_13 = arith.constant 0 : index
    %c0_14 = arith.constant 0 : index
    %14 = vector.load %arg11[%c0_13, %c0_14] : memref<1x128xf32, #tpu.memory_space<vmem>>, vector<1x128xf32>
    %15 = vector.broadcast %14 : vector<1x128xf32> to vector<8x128xf32>
    %16 = arith.addf %13, %15 : vector<8x128xf32>
    %c0_15 = arith.constant 0 : index
    %c0_16 = arith.constant 0 : index
    %17 = vector.load %arg13[%c0_15, %c0_16] : memref<8x128xf32, #tpu.memory_space<vmem>>, vector<8x128xf32>
    %cst_17 = arith.constant dense<0.000000e+00> : vector<8x8xf32>
    %18 = tpu.matmul %17, %11, %cst_17 {dimension_numbers = #tpu.dot_dimension_numbers<[1], [1], [0], [0], [0, 0, 1, 0], [], []>} : vector<8x128xf32>, vector<8x128xf32>, vector<8x8xf32> -> vector<8x8xf32>
    %c0_18 = arith.constant 0 : index
    %c0_19 = arith.constant 0 : index
    %19 = vector.load %arg15[%c0_18, %c0_19] : memref<8x1xf32, #tpu.memory_space<vmem>>, vector<8x1xf32>
    %cst_20 = arith.constant dense<0xFF800000> : vector<8xf32>
    %20 = vector.multi_reduction <maximumf>, %18, %cst_20 [1] : vector<8x8xf32> to vector<8xf32>
    %21 = vector.shape_cast %20 : vector<8xf32> to vector<8x1xf32>
    %22 = arith.maximumf %19, %21 : vector<8x1xf32>
    %23 = arith.subf %19, %22 : vector<8x1xf32>
    %24 = math.exp %23 : vector<8x1xf32>
    %25 = vector.broadcast %22 : vector<8x1xf32> to vector<8x8xf32>
    %26 = arith.subf %18, %25 : vector<8x8xf32>
    %27 = math.exp %26 : vector<8x8xf32>
    %c0_21 = arith.constant 0 : index
    %c0_22 = arith.constant 0 : index
    %28 = vector.load %arg16[%c0_21, %c0_22] : memref<8x1xf32, #tpu.memory_space<vmem>>, vector<8x1xf32>
    %29 = arith.mulf %24, %28 : vector<8x1xf32>
    %cst_23 = arith.constant dense<0.000000e+00> : vector<8xf32>
    %30 = vector.multi_reduction <add>, %27, %cst_23 [1] : vector<8x8xf32> to vector<8xf32>
    %31 = vector.shape_cast %30 : vector<8xf32> to vector<8x1xf32>
    %32 = arith.addf %29, %31 : vector<8x1xf32>
    %c0_24 = arith.constant 0 : index
    %c0_25 = arith.constant 0 : index
    %33 = vector.load %arg16[%c0_24, %c0_25] : memref<8x1xf32, #tpu.memory_space<vmem>>, vector<8x1xf32>
    tpu.vector_store %arg16[%c0_24, %c0_25], %32 {strides = array<i32>} : memref<8x1xf32, #tpu.memory_space<vmem>>, vector<8x1xf32>,
    %c0_26 = arith.constant 0 : index
    %c0_27 = arith.constant 0 : index
    %34 = vector.load %arg14[%c0_26, %c0_27] : memref<8x128xf32, #tpu.memory_space<vmem>>, vector<8x128xf32>
    %35 = vector.broadcast %24 : vector<8x1xf32> to vector<8x128xf32>
    %36 = arith.mulf %35, %34 : vector<8x128xf32>
    %cst_28 = arith.constant dense<0.000000e+00> : vector<8x128xf32>
    %37 = tpu.matmul %27, %16, %cst_28 {dimension_numbers = #tpu.dot_dimension_numbers<[1], [0], [0], [1], [0, 0, 1, 1], [], []>} : vector<8x8xf32>, vector<8x128xf32>, vector<8x128xf32> -> vector<8x128xf32>
    %38 = arith.addf %36, %37 : vector<8x128xf32>
    %c0_29 = arith.constant 0 : index
    %c0_30 = arith.constant 0 : index
    %39 = vector.load %arg14[%c0_29, %c0_30] : memref<8x128xf32, #tpu.memory_space<vmem>>, vector<8x128xf32>
    tpu.vector_store %arg14[%c0_29, %c0_30], %38 {strides = array<i32>} : memref<8x128xf32, #tpu.memory_space<vmem>>, vector<8x128xf32>,
    %c0_31 = arith.constant 0 : index
    %c0_32 = arith.constant 0 : index
    %40 = vector.load %arg15[%c0_31, %c0_32] : memref<8x1xf32, #tpu.memory_space<vmem>>, vector<8x1xf32>
    tpu.vector_store %arg15[%c0_31, %c0_32], %22 {strides = array<i32>} : memref<8x1xf32, #tpu.memory_space<vmem>>, vector<8x1xf32>,
    %c0_i32_33 = arith.constant 0 : i32
    %41 = arith.cmpi eq, %arg2, %c0_i32_33 : i32
    %42 = arith.extui %41 : i1 to i32
    %c0_i32_34 = arith.constant 0 : i32
    %43 = arith.cmpi ne, %42, %c0_i32_34 : i32
    scf.if %43 {
      %c0_35 = arith.constant 0 : index
      %c0_36 = arith.constant 0 : index
      %44 = vector.load %arg16[%c0_35, %c0_36] : memref<8x1xf32, #tpu.memory_space<vmem>>, vector<8x1xf32>
      %45 = tpu.reciprocal %44 {approx = true} : vector<8x1xf32> -> vector<8x1xf32>
      %c0_37 = arith.constant 0 : index
      %c0_38 = arith.constant 0 : index
      %46 = vector.load %arg16[%c0_37, %c0_38] : memref<8x1xf32, #tpu.memory_space<vmem>>, vector<8x1xf32>
      %47 = arith.mulf %46, %45 : vector<8x1xf32>
      %cst_39 = arith.constant 2.000000e+00 : f32
      %48 = vector.broadcast %cst_39 : f32 to vector<8x1xf32>
      %49 = arith.subf %48, %47 : vector<8x1xf32>
      %50 = arith.mulf %45, %49 : vector<8x1xf32>
      %c0_40 = arith.constant 0 : index
      %c0_41 = arith.constant 0 : index
      %51 = vector.load %arg14[%c0_40, %c0_41] : memref<8x128xf32, #tpu.memory_space<vmem>>, vector<8x128xf32>
      %52 = vector.broadcast %50 : vector<8x1xf32> to vector<8x128xf32>
      %53 = arith.mulf %51, %52 : vector<8x128xf32>
      %c0_42 = arith.constant 0 : index
      %c0_43 = arith.constant 0 : index
      %c0_44 = arith.constant 0 : index
      %54 = vector.load %arg12[%c0_42, %c0_43, %c0_44] : memref<1x8x128xf32, #tpu.memory_space<vmem>>, vector<1x8x128xf32>
      %55 = vector.shape_cast %54 : vector<1x8x128xf32> to vector<8x128xf32>
      %56 = vector.shape_cast %53 : vector<8x128xf32> to vector<1x8x128xf32>
      tpu.vector_store %arg12[%c0_42, %c0_43, %c0_44], %56 {strides = array<i32>} : memref<1x8x128xf32, #tpu.memory_space<vmem>>, vector<1x8x128xf32>,
    } else {
    }
    return
  }
  func.func @transform_0(%arg0: i32, %arg1: i32, %arg2: i32) -> (i32, i32, i32) {
    %c0_i32 = arith.constant 0 : i32
    %c0_i32_0 = arith.constant 0 : i32
    return %arg0, %arg1, %c0_i32 : i32, i32, i32
  }
  func.func @transform_1(%arg0: i32, %arg1: i32, %arg2: i32) -> (i32, i32, i32) {
    %c0_i32 = arith.constant 0 : i32
    %c0_i32_0 = arith.constant 0 : i32
    return %arg0, %arg2, %c0_i32 : i32, i32, i32
  }
  func.func @transform_2(%arg0: i32, %arg1: i32, %arg2: i32) -> (i32, i32, i32) {
    %c0_i32 = arith.constant 0 : i32
    %c0_i32_0 = arith.constant 0 : i32
    return %arg0, %arg2, %c0_i32 : i32, i32, i32
  }
  func.func @transform_3(%arg0: i32, %arg1: i32, %arg2: i32) -> (i32, i32) {
    %c0_i32 = arith.constant 0 : i32
    %c0_i32_0 = arith.constant 0 : i32
    %c0_i32_1 = arith.constant 0 : i32
    return %c0_i32, %c0_i32_0 : i32, i32
  }
  func.func @transform_4(%arg0: i32, %arg1: i32, %arg2: i32) -> (i32, i32) {
    %c0_i32 = arith.constant 0 : i32
    %c0_i32_0 = arith.constant 0 : i32
    %c0_i32_1 = arith.constant 0 : i32
    return %c0_i32, %c0_i32_0 : i32, i32
  }
  func.func @transform_5(%arg0: i32, %arg1: i32, %arg2: i32) -> (i32, i32) {
    %c0_i32 = arith.constant 0 : i32
    %c0_i32_0 = arith.constant 0 : i32
    %c0_i32_1 = arith.constant 0 : i32
    return %c0_i32, %c0_i32_0 : i32, i32
  }
  func.func @transform_6(%arg0: i32, %arg1: i32, %arg2: i32) -> (i32, i32) {
    %c0_i32 = arith.constant 0 : i32
    %c0_i32_0 = arith.constant 0 : i32
    %c0_i32_1 = arith.constant 0 : i32
    return %c0_i32, %c0_i32_0 : i32, i32
  }
  func.func @transform_7(%arg0: i32, %arg1: i32, %arg2: i32) -> (i32, i32) {
    %c0_i32 = arith.constant 0 : i32
    %c0_i32_0 = arith.constant 0 : i32
    %c0_i32_1 = arith.constant 0 : i32
    return %c0_i32, %c0_i32_0 : i32, i32
  }
  func.func @transform_8(%arg0: i32, %arg1: i32, %arg2: i32) -> (i32, i32) {
    %c0_i32 = arith.constant 0 : i32
    %c0_i32_0 = arith.constant 0 : i32
    %c0_i32_1 = arith.constant 0 : i32
    return %c0_i32, %c0_i32_0 : i32, i32
  }
  func.func @transform_9(%arg0: i32, %arg1: i32, %arg2: i32) -> (i32, i32, i32) {
    %c0_i32 = arith.constant 0 : i32
    %c0_i32_0 = arith.constant 0 : i32
    return %arg0, %arg1, %c0_i32 : i32, i32, i32
  }
}

</mosaic_0001>

<bundles_post_ra>
// kernel: tpu_custom_call.1
= control target key start
LH: loop header
LB: loop body
LE: loop exit
PB: predicated region body
PF: predicated region fallthrough
CT: control target
= control target key end

     0   :  { %s2061_s0 = inlined_call_operand.hbm [shape: f32[2,8,32], index: 0, kind: input, shape index: {}]   ;;  %s2062_s1 = inlined_call_operand.hbm [shape: f32[2,8,32], index: 1, kind: input, shape index: {}]   ;;  %s2063_s2 = inlined_call_operand.hbm [shape: f32[2,8,32], index: 2, kind: input, shape index: {}]   ;;  %s2064_s3 = inlined_call_operand.hbm [shape: f32[32,128], index: 3, kind: input, shape index: {}]   ;;  %s2065_s4 = inlined_call_operand.hbm [shape: f32[32,128], index: 4, kind: input, shape index: {}]   ;;  %s2066_s5 = inlined_call_operand.hbm [shape: f32[32,128], index: 5, kind: input, shape index: {}]   ;;  %s2067_s6 = inlined_call_operand.vmem [shape: f32[1,128], index: 6, kind: input, shape index: {}]   ;;  %s2068_s7 = inlined_call_operand.vmem [shape: f32[1,128], index: 7, kind: input, shape index: {}]   ;;  %s2069_s8 = inlined_call_operand.vmem [shape: f32[1,128], index: 8, kind: input, shape index: {}]   ;;  %s2070_s9 = inlined_call_operand.hbm [shape: f32[2,8,128], index: 9, kind: output, shape index: {}]  }
   0x1   :  { %2097 = sst [smem:[#allocation31_spill]] %s2062_s1 }
   0x2   :  { %2098 = sst [smem:[#allocation32_spill]] %s2064_s3 }
   0x3   :  { %2099 = sst [smem:[#allocation33_spill]] %s2067_s6 }
   0x4   :  { %2100 = sst [smem:[#allocation34_spill]] %s2069_s8 }
   0x5   :  { %2101 = sst [smem:[#allocation35_spill]] %s2070_s9 }
   0x6   :  { %14 = vsyncpa [#allocation7], 0 }
   0x7   :  { %16 = vsyncpa [#allocation7 + $0x1], 0 }
   0x8   :  { %17 = vsyncpa [#allocation10], 0 }
   0x9   :  { %19 = vsyncpa [#allocation10 + $0x1], 0 }
   0xa   :  { %20 = vsyncpa [#allocation13], 0 }
   0xb   :  { %21 = vsyncpa [#allocation16], 0 }
   0xc   :  { %22 = vsyncpa [#allocation8], 0 }
   0xd   :  { %24 = vsyncpa [#allocation8 + $0x1], 0  ;;  %s1691_s30 = smov 0   ;;  %s1693_s10 = smov 0  }
   0xe   :  { %s1695_s11 = smov 0   ;;  %s1697_s12 = smov 0  }
   0xf   :  { %s1699_s13 = smov 0   ;;  %s1701_s14 = smov 0  }
  0x10 LB: > { %2102 = sst [smem:[#allocation23_spill]] %s1605_s30  ;;  %s1722_s15 = sadd.s32 4294967295, %s1625_s14   ;;  %s1625_s14 = sphi %s1701_s14, %s30_s14   ;;  %s1621_s13 = sphi %s1699_s13, %s2148_s13   ;;  %s1617_s12 = sphi %s1697_s12, %s2147_s12   ;;  %s1613_s11 = sphi %s1695_s11, %s2151_s11   ;;  %s1609_s10 = sphi %s1693_s10, %s2150_s10   ;;  %s1605_s30 = sphi %s1691_s30, %s2149_s30  }
  0x11   : > { %2103 = sst [smem:[#allocation24_spill]] %s1617_s12  ;;  %s1128_s16 = sadd.s32 4294967294, %s1625_s14  }
  0x12   : > { %2104 = sst [smem:[#allocation25_spill]] %s1621_s13  ;;  %p71_p0 = scmp.ne.s32.totalorder %s1609_s10, %s1605_s30 }
  0x13   : > { %2105 = sst [smem:[#allocation26_spill]] %s1625_s14  ;;  %p2071_p1 = scmp.eq.s32.totalorder %s1722_s15, 0 }
  0x14   : > { %p285_p3 = scmp.eq.s32.totalorder %s1128_s16, 1  ;;  %p1129_p5 = scmp.ge.s32.totalorder %s1625_s14, 1 }
  0x15   : > { %p1731_p4 = por %p2071_p1, %p71_p0  ;;  %p292_p7 = scmp.lt.s32.totalorder %s1625_s14, 3 }
  0x16   : > { %p1736_p6 = por %p285_p3, %p71_p0  ;;  %s1627_s20 = smov [#allocation12]  }
  0x17   : > { %s2106_s17 = scalar_select %p1731_p4, 1, 0 }
  0x18   : > { %s2107_s18 = scalar_select %p1736_p6, 1, 0 }
  0x19   : > { %p1741_p8 = pnand %p1129_p5, %p292_p7  ;;  %s304_s21 = sshll.u32 %s1627_s20, 4  ;;  %s305_s21 = int_to_ptr.vmem [resolvable:$true] %s304_s21 }
  0x1a   : > { %2108 = sst [smem:[#allocation27_spill]] %s2107_s18  ;;  %s49_s23 = sadd.s32 1, %s1621_s13 }
  0x1b   : > { %s2109_s19 = scalar_select %p1741_p8, 1, 0 }
  0x1c   : > { %p1259_p9 = pneg %p1741_p8  ;;  %s2111_s3 = sld [smem:[#allocation32_spill]] }
  0x1e   : > { %p1750_p11 = pnand %p1259_p9, %p2071_p1 }
  0x20   : > { %s2110_s22 = scalar_select %p1750_p11, 1, 0 }
  0x21   : > { %p1763_p13 = pneg %p1750_p11 }
  0x22   : > { %s1357_s26 = scalar_lea.hbm %s2111_s3, 512 }
  0x23   : > { %p1358_p12 = scmp.ne.s32.totalorder %s2111_s3, %s1357_s26  ;;  %p1364_p5 = scmp.lt.u32.totalorder %s1357_s26, %s2111_s3 }
  0x24   : > { %s2112_s29 = scalar_select %p1763_p13, 1, 0 }
  0x25   : > { %p1360_p0 = pnand %p1763_p13, %p1358_p12 }
  0x27   : > { %p1361_p3 = pneg %p1360_p0 }
  0x29   : > { %p1366_p7 = pnand %p1364_p5, %p1361_p3 }
  0x2b   : > { %1369 = shalt.err (!%p1366_p7)
}
  0x2c   : > { %s1370_s24 = scalar_lea.vmem %s305_s21, 512  ;;  %p1378_p2 = scmp.lt.s32.totalorder %s305_s21, %s305_s21 }
  0x2d   : > { %p1371_p9 = scmp.ne.s32.totalorder %s305_s21, %s1370_s24  ;;  %p1379_p6 = scmp.lt.s32.totalorder %s1370_s24, %s1370_s24 }
  0x2f   : > { %p1373_p10 = pnand %p1371_p9, %p1763_p13  ;;  %p1380_p4 = por %p1379_p6, %p1378_p2 }
  0x31   : > { %p1374_p1 = pneg %p1373_p10 }
  0x33   : > { %p1381_p8 = pnand %p1380_p4, %p1374_p1 }
  0x35   : > { %1384 = shalt.err (!%p1381_p8)
}
  0x36   : > { %s2075_s25 = smov 128   ;;  %s2077_s26 = smov 8  }
  0x37   : > { %1262 = dma.hbm_to_vmem [thread:$0]  (!%p1750_p11), %s2111_s3, 512, %s305_s21, [#allocation13], %s2075_s25, %s2075_s25, %s2077_s26  }
  0x38   : > { %p51_p1 = scmp.ge.s32.totalorder %s49_s23, 2  ;;  %s58_s16 = sadd.s32 1, %s1613_s11 }
  0x39   : > { %p65_p2 = scmp.ne.s32.totalorder %s1613_s11, %s1609_s10  ;;  %p66_p4 = scmp.eq.s32.totalorder %s1625_s14, 0 }
  0x3a   : > { %s2153_s23 = smov (%p51_p1, %s49_s23), 0  ;;  %p2114_p8 = scmp.eq.s32.totalorder %s1722_s15, 1 }
  0x3b   : > { %2113 = sst [smem:[#allocation28_spill]] %s2153_s23  ;;  %p67_p6 = por %p66_p4, %p65_p2 }
  0x3c   : > { %p1790_p10 = por %p2114_p8, %p65_p2  ;;  %s53_s24 = ssub.s32 %s1621_s13, %s2153_s23 }
  0x3d   : > { %p1286_p12 = scmp.lt.s32.totalorder %s1625_s14, 2  ;;  %p56_p0 = scmp.eq.s32.totalorder %s53_s24, 0 }
  0x3e   : > { %s2115_s20 = scalar_select %p1790_p10, 1, 0 }
  0x3f   : > { %s2080_s18 = sand.u32 1, %s1613_s11   ;;  %s1803_s27 = sshll.u32 %s1621_s13, 7 }
  0x40   : > { %2116 = sst [smem:[#allocation29_spill]] %s2115_s20  ;;  %s1800_s21 = sshll.u32 %s2080_s18, 3 }
  0x41   : > { %s1806_s28 = scalar_select %p56_p0, %s1613_s11, %s58_s16  }
  0x42   : > { %p1808_p3 = pnand %p1286_p12, %p67_p6  ;;  %s372_s26 = sand.u32 1, %s1625_s14  }
  0x43   : > { %2117 = sst [smem:[#allocation30_spill]] %s1806_s28  ;;  %s2119_s1 = sld [smem:[#allocation31_spill]] }
  0x44   : > { %s2118_s25 = scalar_select %p1808_p3, 1, 0 }
  0x45   : > { %s376_s18 = scalar_lea.vmem [#allocation9], %s1800_s21  ;;  %s1630_s16 = smov [#allocation14]  }
  0x46   : > { %s384_s13 = sshll.u32 %s376_s18, 4  ;;  %s1822_s28 = sshll.u32 %s1630_s16, 4  ;;  %s1820_s13 = int_to_ptr.vmem [resolvable:$true] %s384_s13  ;;  %s318_s28 = int_to_ptr.vmem [resolvable:$true] %s1822_s28 }
  0x47   : > { %s1824_s30 = scalar_lea.sflag [#allocation10], %s372_s26  ;;  %p1830_p7 = pneg %p1808_p3 }
  0x49   : > { %s1817_s24 = scalar_lea.hbm %s2119_s1, %s1803_s27  ;;  %s1390_s14 = scalar_lea.hbm %s2119_s1, 256 }
  0x4a   : > { %s1385_s9 = scalar_lea.hbm %s1817_s24, 128  ;;  %p1391_p2 = scmp.lt.u32.totalorder %s1817_s24, %s2119_s1 }
  0x4b   : > { %p1386_p5 = scmp.ne.s32.totalorder %s1817_s24, %s1385_s9  ;;  %p1392_p4 = scmp.lt.u32.totalorder %s1390_s14, %s1385_s9 }
  0x4c   : > { %s2120_s3 = scalar_select %p1830_p7, 1, 0 }
  0x4d   : > { %p1388_p9 = pnand %p1830_p7, %p1386_p5  ;;  %p1393_p6 = por %p1392_p4, %p1391_p2 }
  0x4e   : > { %p1394_p8 = scmp.lt.u32.totalorder %s1385_s9, %s1817_s24 }
  0x4f   : > { %p1389_p1 = pneg %p1388_p9 }
  0x50   : > { %p1395_p12 = por %p1394_p8, %p1393_p6 }
  0x52   : > { %p1396_p0 = pnand %p1395_p12, %p1389_p1 }
  0x54   : > { %1399 = shalt.err (!%p1396_p0)
}
  0x55   : > { %s1400_s26 = scalar_lea.vmem %s1820_s13, 128  ;;  %s1631_s23 = smov [#allocation9]  }
  0x56   : > { %p1401_p5 = scmp.ne.s32.totalorder %s1820_s13, %s1400_s26  ;;  %s1405_s18 = sshll.u32 %s1631_s23, 4  ;;  %s1406_s18 = int_to_ptr.vmem [resolvable:$false] %s1405_s18 }
  0x57   : > { %s1407_s20 = scalar_lea.vmem %s1406_s18, 256  ;;  %p1408_p11 = scmp.lt.s32.totalorder %s1820_s13, %s1406_s18 }
  0x58   : > { %p1403_p9 = pnand %p1401_p5, %p1830_p7  ;;  %p1409_p13 = scmp.lt.s32.totalorder %s1407_s20, %s1400_s26 }
  0x5a   : > { %p1404_p10 = pneg %p1403_p9  ;;  %p1410_p2 = por %p1409_p13, %p1408_p11 }
  0x5c   : > { %p1411_p4 = pnand %p1410_p2, %p1404_p10 }
  0x5e   : > { %1414 = shalt.err (!%p1411_p4)
}
  0x5f   : > { %1275 = dma.hbm_to_vmem [thread:$0]  (!%p1808_p3), %s1817_s24, 128, %s1820_s13, %s1824_s30  }
  0x60   : > { %s1415_s16 = scalar_lea.hbm %s2065_s4, 512  ;;  %p2121_p11 = scmp.ne.s32.totalorder %s2112_s29, 0 }
  0x61   : > { %p1416_p1 = scmp.ne.s32.totalorder %s2065_s4, %s1415_s16  ;;  %p1422_p6 = scmp.lt.u32.totalorder %s1415_s16, %s2065_s4 }
  0x63   : > { %p1418_p13 = pnand %p1416_p1, %p2121_p11 }
  0x65   : > { %p1419_p10 = pneg %p1418_p13 }
  0x67   : > { %p1424_p8 = pnand %p1422_p6, %p1419_p10 }
  0x69   : > { %1427 = shalt.err (!%p1424_p8)
}
  0x6a   : > { %s1428_s20 = scalar_lea.vmem %s318_s28, 512  ;;  %p1436_p9 = scmp.lt.s32.totalorder %s318_s28, %s318_s28 }
  0x6b   : > { %p1429_p12 = scmp.ne.s32.totalorder %s318_s28, %s1428_s20  ;;  %p1437_p2 = scmp.lt.s32.totalorder %s1428_s20, %s1428_s20 }
  0x6d   : > { %p1431_p0 = pnand %p1429_p12, %p2121_p11  ;;  %p1438_p4 = por %p1437_p2, %p1436_p9 }
  0x6f   : > { %p1432_p5 = pneg %p1431_p0 }
  0x71   : > { %p1439_p3 = pnand %p1438_p4, %p1432_p5 }
  0x73   : > { %1442 = shalt.err (!%p1439_p3)
}
  0x74   : > { %p2122_p1 = scmp.ne.s32.totalorder %s2110_s22, 0  ;;  %s2123_s1 = smov 8  }
  0x75   : > { %s2124_s13 = smov 128   ;;  %s1632_s14 = smov [#allocation15]  }
  0x76   : > { %1265 = dma.hbm_to_vmem [thread:$0]  (!%p2122_p1), %s2065_s4, 512, %s318_s28, [#allocation13], %s2124_s13, %s2124_s13, %s2123_s1  }
  0x77   : > { %s330_s16 = sshll.u32 %s1632_s14, 4  ;;  %s1443_s18 = scalar_lea.hbm %s2066_s5, 512  ;;  %s331_s16 = int_to_ptr.vmem [resolvable:$true] %s330_s16 }
  0x78   : > { %p1444_p3 = scmp.ne.s32.totalorder %s2066_s5, %s1443_s18  ;;  %p1450_p6 = scmp.lt.u32.totalorder %s1443_s18, %s2066_s5 }
  0x7a   : > { %p1446_p13 = pnand %p1444_p3, %p2121_p11 }
  0x7c   : > { %p1447_p10 = pneg %p1446_p13 }
  0x7e   : > { %p1452_p8 = pnand %p1450_p6, %p1447_p10 }
  0x80   : > { %1455 = shalt.err (!%p1452_p8)
}
  0x81   : > { %s1456_s28 = scalar_lea.vmem %s331_s16, 512  ;;  %p1464_p9 = scmp.lt.s32.totalorder %s331_s16, %s331_s16 }
  0x82   : > { %p1457_p12 = scmp.ne.s32.totalorder %s331_s16, %s1456_s28  ;;  %p1465_p2 = scmp.lt.s32.totalorder %s1456_s28, %s1456_s28 }
  0x84   : > { %p1459_p0 = pnand %p1457_p12, %p2121_p11  ;;  %p1466_p4 = por %p1465_p2, %p1464_p9 }
  0x86   : > { %p1460_p5 = pneg %p1459_p0 }
  0x88   : > { %p1467_p7 = pnand %p1466_p4, %p1460_p5 }
  0x8a   : > { %1470 = shalt.err (!%p1467_p7)
}
  0x8b   : > { %1268 = dma.hbm_to_vmem [thread:$0]  (!%p2122_p1), %s2066_s5, 512, %s331_s16, [#allocation16], %s2124_s13, %s2124_s13, %s2123_s1  }
  0x8c   : > { %s1901_s24 = scalar_lea.hbm %s2061_s0, %s1803_s27  ;;  %s357_s22 = scalar_lea.vmem [#allocation6], %s1800_s21 }
  0x8d   : > { %s365_s9 = sshll.u32 %s357_s22, 4  ;;  %s2125_s14 = sand.u32 1, %s1613_s11   ;;  %s366_s9 = int_to_ptr.vmem [resolvable:$true] %s365_s9 }
  0x8e   : > { %s354_s23 = scalar_lea.sflag [#allocation7], %s2125_s14  ;;  %s1471_s26 = scalar_lea.hbm %s1901_s24, 128 }
  0x8f   : > { %p1472_p7 = scmp.ne.s32.totalorder %s1901_s24, %s1471_s26  ;;  %p2126_p11 = scmp.ne.s32.totalorder %s2120_s3, 0 }
  0x90   : > { %s1476_s16 = scalar_lea.hbm %s2061_s0, 256  ;;  %p1477_p1 = scmp.lt.u32.totalorder %s1901_s24, %s2061_s0 }
  0x91   : > { %p1474_p3 = pnand %p1472_p7, %p2126_p11  ;;  %p1478_p10 = scmp.lt.u32.totalorder %s1476_s16, %s1471_s26 }
  0x92   : > { %p1480_p8 = scmp.lt.u32.totalorder %s1471_s26, %s1901_s24 }
  0x93   : > { %p1475_p13 = pneg %p1474_p3  ;;  %p1479_p6 = por %p1478_p10, %p1477_p1 }
  0x95   : > { %p1481_p12 = por %p1480_p8, %p1479_p6 }
  0x97   : > { %p1482_p0 = pnand %p1481_p12, %p1475_p13 }
  0x99   : > { %1485 = shalt.err (!%p1482_p0)
}
  0x9a   : > { %s1486_s28 = scalar_lea.vmem %s366_s9, 128  ;;  %s1633_s6 = smov [#allocation6]  }
  0x9b   : > { %p1487_p5 = scmp.ne.s32.totalorder %s366_s9, %s1486_s28  ;;  %s1491_s8 = sshll.u32 %s1633_s6, 4  ;;  %s1492_s8 = int_to_ptr.vmem [resolvable:$false] %s1491_s8 }
  0x9c   : > { %s1493_s12 = scalar_lea.vmem %s1492_s8, 256  ;;  %p1494_p4 = scmp.lt.s32.totalorder %s366_s9, %s1492_s8 }
  0x9d   : > { %p1489_p9 = pnand %p1487_p5, %p2126_p11  ;;  %p1495_p7 = scmp.lt.s32.totalorder %s1493_s12, %s1486_s28 }
  0x9f   : > { %p1490_p2 = pneg %p1489_p9  ;;  %p1496_p3 = por %p1495_p7, %p1494_p4 }
  0xa1   : > { %p1497_p1 = pnand %p1496_p3, %p1490_p2 }
  0xa3   : > { %1500 = shalt.err (!%p1497_p1)
}
  0xa4   : > { %p2127_p10 = scmp.ne.s32.totalorder %s2118_s25, 0  ;;  %s1927_s14 = scalar_lea.hbm %s2063_s2, %s1803_s27 }
  0xa5   : > { %s395_s26 = scalar_lea.vmem [#allocation11], %s1800_s21  ;;  %s1501_s13 = scalar_lea.hbm %s1927_s14, 128 }
  0xa6   : > { %1272 = dma.hbm_to_vmem [thread:$0]  (!%p2127_p10), %s1901_s24, 128, %s366_s9, %s354_s23  }
  0xa7   : > { %s403_s1 = sshll.u32 %s395_s26, 4  ;;  %p1502_p13 = scmp.ne.s32.totalorder %s1927_s14, %s1501_s13  ;;  %s404_s1 = int_to_ptr.vmem [resolvable:$true] %s403_s1 }
  0xa8   : > { %s1506_s24 = scalar_lea.hbm %s2063_s2, 256  ;;  %p1507_p12 = scmp.lt.u32.totalorder %s1927_s14, %s2063_s2 }
  0xa9   : > { %p1504_p6 = pnand %p1502_p13, %p2126_p11  ;;  %p1508_p0 = scmp.lt.u32.totalorder %s1506_s24, %s1501_s13 }
  0xaa   : > { %p1510_p9 = scmp.lt.u32.totalorder %s1501_s13, %s1927_s14 }
  0xab   : > { %p1505_p8 = pneg %p1504_p6  ;;  %p1509_p5 = por %p1508_p0, %p1507_p12 }
  0xad   : > { %p1511_p2 = por %p1510_p9, %p1509_p5 }
  0xaf   : > { %p1512_p4 = pnand %p1511_p2, %p1505_p8 }
  0xb1   : > { %1515 = shalt.err (!%p1512_p4)
}
  0xb2   : > { %s1516_s21 = scalar_lea.vmem %s404_s1, 128  ;;  %s1634_s27 = smov [#allocation11]  }
  0xb3   : > { %p1517_p7 = scmp.ne.s32.totalorder %s404_s1, %s1516_s21  ;;  %s1521_s20 = sshll.u32 %s1634_s27, 4  ;;  %s1522_s20 = int_to_ptr.vmem [resolvable:$false] %s1521_s20 }
  0xb4   : > { %s1523_s28 = scalar_lea.vmem %s1522_s20, 256  ;;  %p1524_p13 = scmp.lt.s32.totalorder %s404_s1, %s1522_s20 }
  0xb5   : > { %p1519_p3 = pnand %p1517_p7, %p2126_p11  ;;  %p1525_p6 = scmp.lt.s32.totalorder %s1523_s28, %s1516_s21 }
  0xb7   : > { %p1520_p1 = pneg %p1519_p3  ;;  %p1526_p10 = por %p1525_p6, %p1524_p13 }
  0xb9   : > { %p1527_p0 = pnand %p1526_p10, %p1520_p1 }
  0xbb   : > { %1530 = shalt.err (!%p1527_p0)
}
  0xbc   : > { %p2128_p12 = scmp.ne.s32.totalorder %s2118_s25, 0  ;;  %p2129_p8 = scmp.ne.s32.totalorder %s2109_s19, 0 }
  0xbd   : > { %s1951_s3 = sand.u32 (!%p2129_p8), 1, %s1609_s10   ;;  %p2130_p11 = scmp.ne.s32.totalorder (!%p2129_p8), %s2106_s17, 0 }
  0xbe   : > { %1278 = dma.hbm_to_vmem [thread:$0]  (!%p2128_p12), %s1927_s14, 128, %s404_s1, %s1824_s30  }
  0xbf   : > { %412 = sbr.rel (%p2129_p8) target bundleno = 1251 (0x4e3), region = 56  ;;  %s1954_s6 = sshll.u32 (!%p2129_p8), %s1951_s3, 3 }
  0xc0   : > { %s415_s8 = scalar_lea.sflag (!%p2129_p8), [#allocation7], %s1951_s3  ;;  %s418_s12 = scalar_lea.vmem (!%p2129_p8), [#allocation6], %s1954_s6 }
  0xc6   : > { %1584 = dma.done.wait (%p2130_p11), %s415_s8, 128  }
  0xc7   : > { %1586 = vsyncadd (%p2130_p11), %s415_s8, 4294967168  ;;  %s423_s30 = sand.u32 1, %s1722_s15   ;;  %s427_s25 = scalar_lea.vmem [#allocation9], %s1954_s6 }
  0xc8   : > { %s424_s19 = scalar_lea.sflag [#allocation10], %s423_s30 }
  0xc9   : > { %1588 = dma.done.wait (%p2130_p11), %s424_s19, 256  }
  0xca   : > { %1590 = vsyncadd (%p2130_p11), %s424_s19, 4294967040  ;;  %s436_s29 = scalar_lea.vmem [#allocation11], %s1954_s6  ;;  %p2131_p10 = scmp.eq.s32.totalorder %s1722_s15, 0 }
  0xcc   : > { %1592 = dma.done.wait (%p2131_p10), [#allocation13], 1024   ;;  %p2132_p5 = pmov %p2131_p10 }
  0xce   : > { %1594 = vsyncadd (%p2132_p5), [#allocation13], 4294966272  ;;  %p2133_p9 = pmov %p2132_p5 }
  0xcf   : > { %p2134_p2 = pmov %p2132_p5 }
  0xd0   : > { %1596 = dma.done.wait (%p2133_p9), [#allocation16], 512  }
  0xd1   : > { %1598 = vsyncadd (%p2134_p2), [#allocation16], 4294966784  ;;  %v1635_v0 = vmov 0.0|0.0   ;;  %vm1636_vm0 = vmmov 0   ;;  %v1637_v1 = vmov 0.0   ;;  %v591_v2 = vld [vmem:[#allocation14] sm:$0xff] }
  0xd2   : > { %1227 = vmatprep.subr.bf16.mxu1 %v1635_v0  ;;  %1221 = vmatprep.subr.bf16.mxu0 %v1635_v0  ;;  %v592_v3 = vld [vmem:[#allocation14 + $0x8] sm:$0xff]  ;;  %v498_v4 = vld [vmem:[#allocation12] sm:$0xff]  ;;  %v593_v7 = vld [vmem:[#allocation14 + $0x10] sm:$0xff]  ;;  %vm509_vm1 = vcmask 261120   ;;  %s2135_s26 = sld [smem:[#allocation33_spill]]  ;;  %vm585_vm2 = vcmask 7168  }
  0xd3   : > { %1197 = vmatprep.mubr.msk.f32.mxu1 %vm1636_vm0, %v1637_v1  ;;  %1186 = vmatprep.mubr.msk.f32.mxu0 %vm1636_vm0, %v1637_v1  ;;  %v1228_v5 = vpack.c.bf16 %v592_v3, %v591_v2  ;;  %v499_v6 = vld [vmem:[#allocation12 + $0x8] sm:$0xff]  ;;  %v594_v8 = vld [vmem:[#allocation14 + $0x18] sm:$0xff]  ;;  %v500_v10 = vld [vmem:[#allocation12 + $0x10] sm:$0xff]  ;;  %v1638_v30 = vmov -1e+30   ;;  %587 = vst.msk [vmem:[#allocation5] sm:$0xff] %vm585_vm2, %v1637_v1 }
  0xd4   : > { %v1222_v9 = vpack.c.bf16 %v499_v6, %v498_v4  ;;  %v501_v11 = vld [vmem:[#allocation12 + $0x18] sm:$0xff]  ;;  %v1231_v12 = vpack.c.bf16 %v594_v8, %v593_v7  ;;  %v589_v14 = vld [vmem:[%s427_s25] sm:$0xff]  ;;  %v678_v27 = vld [vmem:[#allocation15 + $0x10] sm:$0xff]  ;;  %586 = vst.msk [vmem:[#allocation4] sm:$0xff] %vm585_vm2, %v1638_v30  ;;  %vm832_vm3 = vcmask 64512   ;;  %v1639_v36 = vmov 0  }
  0xd5   : > { %1229 = vmatpush3.bf16.msra.mxu1 %v1228_v5  ;;  %v1225_v13 = vpack.c.bf16 %v501_v11, %v500_v10  ;;  %v497_v15 = vld [vmem:[%s418_s12] sm:$0xff]  ;;  %v1150_v16 = vld [vmem:[%s2068_s7] ss:$0 sm:$0xff]  ;;  %v677_v26 = vld [vmem:[#allocation15 + $0x8] sm:$0xff]  ;;  %1349 = vset.pattern.permute.xlu0 %v1639_v36  ;;  %s2136_s16 = sld [smem:[#allocation34_spill]]  ;;  %s2137_s18 = sld [smem:[#allocation24_spill]] }
  0xd6   : > { %1223 = vmatpush3.bf16.msra.mxu0 %v1222_v9  ;;  %1230 = vmatprep.subr.bf16.mxu1 %v1635_v0  ;;  %v676_v25 = vld [vmem:[#allocation15] sm:$0xff]  ;;  %v679_v29 = vld [vmem:[#allocation15 + $0x18] sm:$0xff]  ;;  %s2138_s24 = sld [smem:[#allocation29_spill]]  ;;  %s492_s23 = scalar_lea.vmem [#allocation17], %s1954_s6 }
  0xd7   : > { %1224 = vmatprep.subr.bf16.mxu0 %v1635_v0  ;;  %v1234_v28 = vpack.c.bf16 %v677_v26, %v676_v25  ;;  %v1237_v31 = vpack.c.bf16 %v679_v29, %v678_v27  ;;  %v590_v32 = vld [vmem:[%s436_s29] sm:$0xff]  ;;  %1350 = vset.pattern.permute.xlu1 %v1639_v36  ;;  %s970_s21 = sshll.u32 %s492_s23, 4  ;;  %s2139_s28 = sld [smem:[#allocation35_spill]]  ;;  %s2014_s21 = int_to_ptr.vmem [resolvable:$true] %s970_s21 }
  0xd8   : > { %v1148_v17 = vld [vmem:[%s2135_s26] ss:$0 sm:$0xff]  ;;  %s956_s12 = scalar_lea.sflag [#allocation8], %s1951_s3  ;;  %s1531_s30 = scalar_lea.vmem %s2014_s21, 128 }
  0xd9   : > { %1232 = vmatpush3.bf16.msra.mxu1 %v1231_v12  ;;  %p1532_p4 = scmp.ne.s32.totalorder %s2014_s21, %s1531_s30  ;;  %s1640_s6 = smov [#allocation17]  }
  0xda   : > { %1226 = vmatpush3.bf16.msra.mxu0 %v1225_v13  ;;  %1211 = vmatprep.subr.mxu1 %v1637_v1  ;;  %v848_v52 = vld [vmem:[#allocation5] sm:$0xff]  ;;  %s1535_s19 = sshll.u32 %s1640_s6, 4  ;;  %s1536_s19 = int_to_ptr.vmem [resolvable:$false] %s1535_s19 }
  0xdb   : > { %1233 = vmatprep.subr.bf16.mxu0 %v1635_v0  ;;  %v831_v37 = vld [vmem:[#allocation4] sm:$0xff]  ;;  %s1156_s9 = sshll.u32 %s2137_s18, 7  ;;  %s1537_s25 = scalar_lea.vmem %s1536_s19, 256 }
  0xdc   : > { %1198 = vmatmul.mubr.msk.f32.vlgmr.msra.gmra.mrb[0].mxu1 %vm509_vm1, %v589_v14  ;;  %v1152_v41 = vld [vmem:[%s2136_s16] ss:$0 sm:$0xff]  ;;  %p2140_p7 = scmp.ne.s32.totalorder %s2138_s24, 0  ;;  %p1538_p13 = scmp.lt.s32.totalorder %s2014_s21, %s1536_s19 }
  0xdd   : > { %1187 = vmatmul.mubr.msk.f32.vlgmr.msra.gmra.mrb[0].mxu0 %vm509_vm1, %v497_v15  ;;  %1213 = vmatprep.mubr.msk.f32.mxu1 %vm1636_vm0, %v1637_v1  ;;  %s2012_s8 = scalar_lea.hbm %s2139_s28, %s1156_s9  ;;  %p1539_p6 = scmp.lt.s32.totalorder %s1537_s25, %s1531_s30 }
  0xde   : > { %1208 = vmatprep.mubr.msk.f32.mxu0 %vm1636_vm0, %v1637_v1  ;;  %1235 = vmatpush3.bf16.msra.mxu0 %v1234_v28  ;;  %p1533_p3 = pnand %p1532_p4, %p2140_p7 }
  0xdf   : > { %1236 = vmatprep.subr.bf16.mxu0 %v1635_v0  ;;  %p1540_p0 = por %p1539_p6, %p1538_p13 }
  0xe0   : > { %p1534_p1 = pneg %p1533_p3 }
  0xe2   : > { %1238 = vmatpush3.bf16.msra.mxu0 %v1237_v31  ;;  %p1541_p12 = pnand %p1540_p0, %p1534_p1 }
  0xe5   : > { %1209 = vmatmul.mubr.msk.f32.vlgmr.msra.gmra.mrb[2].mxu0 %vm509_vm1, %v590_v32 }
 0x1af   : > { %v672_v18 = vpop.f32.mrb[0].mxu1 }
 0x1b0   : > { %v673_v19 = vadd.f32 %v1150_v16, %v672_v18  ;;  %v579_v20 = vpop.f32.mrb[0].mxu0  ;;  %v1199_v21 = vpop.f32.mrb[1].mxu1 }
 0x1b1   : > { %v580_v22 = vadd.f32 %v1148_v17, %v579_v20  ;;  %v1188_v23 = vpop.f32.mrb[1].mxu0 }
 0x1b2   : > { %1212 = vmatpush3.xpose.msra.mxu1 %v673_v19 }
 0x1b3   : > { %v583_v24 = vmul.f32 0.25, %v580_v22  ;;  %1216 = vmatprep.subr.mxu1 %v1637_v1 }
 0x1b5   : > { %1214 = vmatmul.mubr.f32.vlgmr.msra.gmra.mrb[2].mxu1 %v583_v24 }
 0x1b6   : > { %1218 = vmatprep.mubr.msk.f32.mxu1 %vm1636_vm0, %v1637_v1 }
 0x1b8   : > { %v756_v42 = vpop.f32.mrb[2].mxu0 }
 0x1b9   : > { %v757_v43 = vadd.f32 %v1152_v41, %v756_v42  ;;  %v1210_v44 = vpop.f32.mrb[3].mxu0 }
 0x1bb   : > { %1217 = vmatpush3.msra.mxu1 %v757_v43 }
 0x288   : > { %v827_v33 = vpop.f32.mrb[2].mxu1 }
 0x289   : > { %v1215_v34 = vpop.f32.mrb[3].mxu1  ;;  %v833_v35 = vsel %vm832_vm3, %v827_v33, -inf }
 0x28a   : > { %834 = vmax.xlane.f32.xlu0 %v833_v35 }
 0x317   : > { %v835_v38 = vpop.xlane.xlu0 %834 }
 0x318   : > { %v836_v39 = vmax.f32 %v831_v37, %v835_v38 }
 0x31a   : > { %v837_v40 = vsub.f32 %v831_v37, %v836_v39  ;;  %938 = vst.msk [vmem:[#allocation4] sm:$0xff] %vm585_vm2, %v836_v39  ;;  %842 = vperm.xlu0 %1349, %v836_v39  }
 0x31c   : > { %v838_v50 = vmul.f32 1.442695, %v837_v40 }
 0x399   : > { %v843_v45 = vpop.permute.xlu0 %842 }
 0x39a   : > { %v845_v46 = vsub.f32 %v827_v33, %v843_v45 }
 0x39c   : > { %v846_v47 = vmul.f32 1.442695, %v845_v46 }
 0x39e   : > { %1351 = vpow2.f32 %v846_v47 }
 0x39f   : > { %1353 = vpow2.f32 %v838_v50 }
 0x3a8   : > { %v1352_v48 = vpop.eup %1351 }
 0x3a9   : > { %1219 = vmatmul.mubr.msk.f32.vlgmr.msra.gmra.mrb[4].mxu1 %vm832_vm3, %v1352_v48  ;;  %v850_v49 = vsel %vm832_vm3, %v1352_v48, 0.0  ;;  %v1354_v51 = vpop.eup %1353 }
 0x3aa   : > { %851 = vadd.xlane.f32.xlu1 %v850_v49  ;;  %v849_v53 = vmul.f32 %v1354_v51, %v848_v52 }
 0x3bb   : > { %859 = vperm.xlu1 %1350, %v1354_v51  }
 0x437   : > { %v852_v54 = vpop.xlane.xlu1 %851 }
 0x438   : > { %v853_v55 = vadd.f32 %v852_v54, %v849_v53 }
 0x43a   : > { %855 = vst.msk [vmem:[#allocation5] sm:$0xff] %vm585_vm2, %v853_v55 }
 0x43b   : > { %v860_v63 = vpop.permute.xlu1 %859 }
 0x43c   : > { %v862_v0 = vmul.f32 0.0, %v860_v63 }
 0x441   : > { %v942_v56 = vld [vmem:[#allocation5] sm:$0xff] }
 0x442   : > { %1355 = vrcp.f32 %v942_v56 }
 0x44c   : > { %v1356_v57 = vpop.eup %1355 }
 0x44d   : > { %v944_v58 = vmul.f32 %v1356_v57, %v942_v56 }
 0x44f   : > { %v945_v59 = vsub.f32 2.0, %v944_v58 }
 0x451   : > { %v946_v60 = vmul.f32 %v1356_v57, %v945_v59 }
 0x453   : > { %950 = vperm.xlu1 %1350, %v946_v60  }
 0x47c   : > { %v932_v61 = vpop.f32.mrb[4].mxu1 }
 0x47d   : > { %v1220_v62 = vpop.f32.mrb[5].mxu1  ;;  %v936_v1 = vadd.f32 %v932_v61, %v862_v0 }
 0x4d2   : > { %v951_v2 = vpop.permute.xlu1 %950 }
 0x4d3   : > { %v953_v3 = vmul.f32 %v951_v2, %v936_v1 }
 0x4d5   : > { %954 = vst [vmem:[%s492_s23] sm:$0xff] %v953_v3 }
 0x4d6   : > { %1544 = shalt.err (!%p1541_p12)
}
 0x4d7   : > { %s1545_s3 = scalar_lea.hbm %s2012_s8, 128  ;;  %s1549_s17 = scalar_lea.hbm %s2139_s28, 256 }
 0x4d8   : > { %p1546_p8 = scmp.ne.s32.totalorder %s2012_s8, %s1545_s3  ;;  %p1550_p5 = scmp.lt.u32.totalorder %s2012_s8, %s2139_s28 }
 0x4d9   : > { %p1551_p9 = scmp.lt.u32.totalorder %s1549_s17, %s1545_s3  ;;  %p1553_p4 = scmp.lt.u32.totalorder %s1545_s3, %s2012_s8 }
 0x4da   : > { %p1547_p11 = pnand %p1546_p8, %p2140_p7 }
 0x4db   : > { %p1552_p2 = por %p1551_p9, %p1550_p5 }
 0x4dc   : > { %p1548_p10 = pneg %p1547_p11 }
 0x4dd   : > { %p1554_p3 = por %p1553_p4, %p1552_p2 }
 0x4df   : > { %p1555_p1 = pnand %p1554_p3, %p1548_p10 }
 0x4e1   : > { %1558 = shalt.err (!%p1555_p1)
}
 0x4e2   : > { %1257 = dma.vmem_to_hbm [thread:$0]  (%p2140_p7), %s2014_s21, 128, %s2012_s8, %s956_s12  }
 0x4e3 PF: > { %s2141_s26 = sld [smem:[#allocation23_spill]]  ;;  %s2142_s1 = sld [smem:[#allocation27_spill]] }
 0x4e4   : > { %s2143_s13 = sld [smem:[#allocation26_spill]] }
 0x4e9   : > { %s982_s16 = sand.u32 1, %s2141_s26   ;;  %p2144_p13 = scmp.ne.s32.totalorder %s2142_s1, 0 }
 0x4ea   : > { %p2145_p6 = scmp.ge.s32.totalorder %s2143_s13, 2  ;;  %s983_s18 = scalar_lea.sflag [#allocation8], %s982_s16 }
 0x4ec   : > { %p1280_p0 = pnand %p2145_p6, %p2144_p13 }
 0x4ee   : > { %1600 = dma.done.wait (!%p1280_p0), %s983_s18, 128  }
 0x4ef   : > { %1602 = vsyncadd (!%p1280_p0), %s983_s18, 4294967168  ;;  %s30_s14 = sadd.s32 1, %s2143_s13   ;;  %s2146_s24 = sld [smem:[#allocation30_spill]] }
 0x4f0   : > { %p27_p12 = scmp.ge.s32.totalorder %s30_s14, 4   ;;  %s2147_s12 = sld [smem:[#allocation25_spill]] }
 0x4f1   : > { %s2148_s13 = sld [smem:[#allocation28_spill]]  ;;  %s2149_s30 = smov %s1609_s10 }
 0x4f2   : > { %s2150_s10 = smov %s1613_s11  ;;  %29 = sbr.rel (!%p27_p12) target bundleno = 16 (0x10), region = 145 }
 0x4f5   : > { %s2151_s11 = smov %s2146_s24 }
 0x4f9   :  { %988 = vsyncpa [#allocation7], 1 }
 0x4fa   :  { %990 = vsyncpa [#allocation7 + $0x1], 1 }
 0x4fb   :  { %991 = vsyncpa [#allocation10], 1 }
 0x4fc   :  { %993 = vsyncpa [#allocation10 + $0x1], 1 }
 0x4fd   :  { %994 = vsyncpa [#allocation13], 1 }
 0x4fe   :  { %995 = vsyncpa [#allocation16], 1 }
 0x4ff   :  { %996 = vsyncpa [#allocation8], 1 }
 0x500   :  { %998 = vsyncpa [#allocation8 + $0x1], 1 }

</bundles_post_ra>
